<compile_context>
chip_gen: v7x
topology: tpu7x:2x2x1
jax: 0.10.0
libtpu: 0.0.40
codegen_flags: <defaults>
</compile_context>

<pallas_src>
import functools
import math

import jax
import jax.numpy as jnp
import numpy as np
from jax import lax
from jax.experimental import pallas as pl
from jax.experimental.pallas import tpu as pltpu


# ---------------------------------------------------------------------------
# chip / tiling helpers
# ---------------------------------------------------------------------------

def _chip_generation():
    """Best-effort TPU generation (4/5/6/7) from device_kind; None if unknown."""
    try:
        kind = jax.devices()[0].device_kind.lower()
    except Exception:
        return None
    for g in (7, 6, 5, 4):
        if f"v{g}" in kind:
            return g
    return None


def _pick_tile(dim, target, align):
    """Largest tile <= target that divides `dim` and is a multiple of `align`;
    falls back to the full dim (block == array extent is always legal)."""
    if dim <= target:
        return dim
    t = (target // align) * align
    while t >= align:
        if dim % t == 0:
            return t
        t -= align
    return dim


def _vmem_limit_bytes():
    # Raise the scoped VMEM limit (helps v5e/v6e); stay <= half physical so v7x
    # (64 MiB/TC) is never over-subscribed.  Guarded: falls back to default.
    try:
        cap = int(pltpu.get_tpu_info().vmem_capacity_bytes)
        return min(cap // 2, 96 * 1024 * 1024)
    except Exception:
        return None


def _linear_tile_targets(gen):
    # v5e/v6e have 128 MiB VMEM -> large tiles amortize per-step overhead (~85% of
    # HBM roofline at 512); v7x has 64 MiB -> keep the smaller tiles.
    if gen == 7:
        return 256, 256, 512
    return 512, 512, 512


def _attn_tile_targets(gen):
    # v5e: lowest HBM BW -> bigger tq cuts KV re-reads; v7x: derate tq to stay
    # well inside its smaller scoped VMEM; v6e / unknown: 256.
    if gen == 7:
        return 128, 256
    if gen is not None and gen <= 5:
        return 512, 256
    return 256, 256


# ---------------------------------------------------------------------------
# Tiled linear (x @ W + b) kernel
# ---------------------------------------------------------------------------

def _linear_kernel(x_ref, w_ref, b_ref, o_ref, acc_ref):
    k = pl.program_id(2)

    @pl.when(k == 0)
    def _init():
        acc_ref[...] = jnp.zeros_like(acc_ref)

    acc_ref[...] += jnp.dot(x_ref[...], w_ref[...],
                            preferred_element_type=jnp.float32)

    @pl.when(k == pl.num_programs(2) - 1)
    def _store():
        o_ref[...] = (acc_ref[...] + b_ref[...]).astype(o_ref.dtype)


def pallas_linear(x2d, w, b, *, out_dtype=None,
                  tm_target=512, tn_target=512, tk_target=512):
    """x2d: (M, K), w: (K, N), b: (N,) f32 -> (M, N) in out_dtype."""
    M, K = x2d.shape
    Kw, N = w.shape
    assert K == Kw
    out_dtype = out_dtype or x2d.dtype

    tm = _pick_tile(M, tm_target, 8)
    tn = _pick_tile(N, tn_target, 128)
    tk = _pick_tile(K, tk_target, 128)
    grid = (M // tm, N // tn, K // tk)

    b2d = b.astype(jnp.float32).reshape(1, N)
    bytes_accessed = (x2d.size * x2d.dtype.itemsize + w.size * w.dtype.itemsize
                      + M * N * jnp.dtype(out_dtype).itemsize + b2d.size * 4)
    cost = pl.CostEstimate(flops=int(2 * M * N * K), transcendentals=0,
                           bytes_accessed=int(bytes_accessed))

    return pl.pallas_call(
        _linear_kernel,
        out_shape=jax.ShapeDtypeStruct((M, N), out_dtype),
        grid=grid,
        in_specs=[
            pl.BlockSpec((tm, tk), lambda i, j, k: (i, k)),
            pl.BlockSpec((tk, tn), lambda i, j, k: (k, j)),
            pl.BlockSpec((1, tn), lambda i, j, k: (0, j)),
        ],
        out_specs=pl.BlockSpec((tm, tn), lambda i, j, k: (i, j)),
        scratch_shapes=[pltpu.VMEM((tm, tn), jnp.float32)],
        compiler_params=pltpu.CompilerParams(
            dimension_semantics=("parallel", "parallel", "arbitrary"),
            vmem_limit_bytes=_vmem_limit_bytes()),
        cost_estimate=cost,
    )(x2d, w, b2d)


# ---------------------------------------------------------------------------
# Flash-style multi-head cross attention kernel
#   q:  (B, T, D)        head h lives in lanes [h*hd, (h+1)*hd)   (pre-scaled)
#   kv: (B, S, 2D)       lanes [0, D) = K heads, lanes [D, 2D) = V heads
#   out:(B, T, D)        already merged head layout (no transpose afterwards)
# ---------------------------------------------------------------------------

def _flash_cross_attn_kernel(tv_ref, sv_ref, q_ref, kv_ref, o_ref,
                             m_sc, l_sc, acc_sc, *, num_heads, head_dim, exp_dtype):
    d_model = num_heads * head_dim
    kv_idx = pl.program_id(2)

    @pl.when(kv_idx == 0)
    def _init():
        m_sc[...] = jnp.full_like(m_sc, -jnp.inf)
        l_sc[...] = jnp.zeros_like(l_sc)
        acc_sc[...] = jnp.zeros_like(acc_sc)

    q = q_ref[0]      # (tq, D)   compute dtype, already scaled by 1/sqrt(hd)
    kv = kv_ref[0]    # (tkv, 2D) compute dtype

    # Hoisted per-tile mask & fill value (shared by all heads -> one select/head).
    # -1e9 fill matches masked_fill(-inf) + clamp(-1e9, 1e9) in the reference
    # (select, not a bias add, so fully-padded rows still give a uniform softmax).
    mask = (tv_ref[0] > 0) & (sv_ref[0] > 0)                  # (tq,1)&(1,tkv)->(tq,tkv)
    neg = jnp.full(mask.shape, -1.0e9, dtype=jnp.float32)
    # NOTE: the reference also clamps to +1e9; omitted (unreachable for real scores).

    for h in range(num_heads):                                 # static unroll over heads
        lo = h * head_dim
        hi = lo + head_dim
        qh = q[:, lo:hi]                                       # (tq, hd)
        kh = kv[:, lo:hi]                                      # (tkv, hd)
        vh = kv[:, d_model + lo:d_model + hi]                  # (tkv, hd)

        # contract the last dims -> no transposed copy of K; bf16 operands, f32 acc
        s = lax.dot_general(qh, kh, (((1,), (1,)), ((), ())),
                            preferred_element_type=jnp.float32)  # (tq, tkv) f32
        s = jnp.where(mask, s, neg)

        m_prev = m_sc[h]                                               # (tq, 1)
        m_new = jnp.maximum(m_prev, jnp.max(s, axis=-1, keepdims=True))
        alpha = jnp.exp(m_prev - m_new)
        # bf16 exp on v6e/v7x (bf16 EUP ~2x f32); f32 on v5e / f32-compute path.
        p = jnp.exp((s - m_new).astype(exp_dtype))                     # (tq, tkv)
        l_sc[h] = alpha * l_sc[h] + jnp.sum(p.astype(jnp.float32),
                                            axis=-1, keepdims=True)
        acc_sc[h] = alpha * acc_sc[h] + jnp.dot(
            p.astype(vh.dtype), vh, preferred_element_type=jnp.float32)
        m_sc[h] = m_new

    @pl.when(kv_idx == pl.num_programs(2) - 1)
    def _store():
        for h in range(num_heads):
            l = l_sc[h]                                        # (tq, 1), > 0 always
            inv = pl.reciprocal(l, approx=True)                # EUP
            inv = inv * (2.0 - l * inv)                        # one Newton step
            lo = h * head_dim
            # direct lane-slice store (no concatenate of sub-128 heads)
            o_ref[0, :, lo:lo + head_dim] = (acc_sc[h] * inv).astype(o_ref.dtype)


def pallas_flash_cross_attention(q, kv, tgt_valid, src_valid, num_heads, *,
                                 exp_dtype=jnp.float32,
                                 tq_target=256, tkv_target=256,
                                 split_query_tiles=False):
    B, T, D = q.shape
    S = kv.shape[1]
    assert D % num_heads == 0
    hd = D // num_heads

    # tq is a second-to-last block dim (multiple of 8 ok); tkv also appears as a
    # last block dim (src-validity) -> multiple of 128 or full extent.
    tq = _pick_tile(T, tq_target, 8)
    # v7x: 2 TensorCores share the grid via the parallel axes -> ensure >= 2 steps.
    if split_query_tiles and B * (T // tq) < 2 and T >= 16:
        tq = _pick_tile(T, max(8, tq // 2), 8)
    tkv = _pick_tile(S, tkv_target, 128)
    grid = (B, T // tq, S // tkv)

    tv = tgt_valid.astype(jnp.int32).reshape(B, T, 1)
    sv = src_valid.astype(jnp.int32).reshape(B, 1, S)

    itm = q.dtype.itemsize
    cost = pl.CostEstimate(
        flops=int(4 * B * num_heads * T * S * hd),
        transcendentals=int(B * num_heads * T * S),
        bytes_accessed=int((B * T * D + B * S * 2 * D + B * T * D) * itm),
    )

    # TODO(synk): optional scalar-prefetch path that skips fully-padded KV tiles
    # (changes the don't-care outputs of fully padded query rows; needs l==0 guard).

    kernel = functools.partial(_flash_cross_attn_kernel,
                               num_heads=num_heads, head_dim=hd,
                               exp_dtype=jnp.dtype(exp_dtype))
    return pl.pallas_call(
        kernel,
        out_shape=jax.ShapeDtypeStruct((B, T, D), q.dtype),
        grid=grid,
        in_specs=[
            pl.BlockSpec((1, tq, 1), lambda b, qi, ki: (b, qi, 0)),      # tgt validity
            pl.BlockSpec((1, 1, tkv), lambda b, qi, ki: (b, 0, ki)),     # src validity
            pl.BlockSpec((1, tq, D), lambda b, qi, ki: (b, qi, 0)),      # q
            pl.BlockSpec((1, tkv, 2 * D), lambda b, qi, ki: (b, ki, 0)), # kv
        ],
        out_specs=pl.BlockSpec((1, tq, D), lambda b, qi, ki: (b, qi, 0)),
        scratch_shapes=[
            pltpu.VMEM((num_heads, tq, 1), jnp.float32),    # running max  m
            pltpu.VMEM((num_heads, tq, 1), jnp.float32),    # running sum  l
            pltpu.VMEM((num_heads, tq, hd), jnp.float32),   # accumulator
        ],
        compiler_params=pltpu.CompilerParams(
            dimension_semantics=("parallel", "parallel", "arbitrary"),
            vmem_limit_bytes=_vmem_limit_bytes()),
        cost_estimate=cost,
    )(tv, sv, q, kv)


# ---------------------------------------------------------------------------
# Parameter handling
# ---------------------------------------------------------------------------

def init_params(key, d_model):
    """Shapes match the nn.Linear layers of the PyTorch module, stored (in, out)."""
    ks = jax.random.split(key, 6)
    s = 1.0 / math.sqrt(d_model)
    return {
        "w_kv": jax.random.uniform(ks[0], (d_model, 2 * d_model), jnp.float32, -s, s),
        "b_kv": jax.random.uniform(ks[1], (2 * d_model,), jnp.float32, -s, s),
        "w_q": jax.random.uniform(ks[2], (d_model, d_model), jnp.float32, -s, s),
        "b_q": jax.random.uniform(ks[3], (d_model,), jnp.float32, -s, s),
        "w_out": jax.random.uniform(ks[4], (d_model, d_model), jnp.float32, -s, s),
        "b_out": jax.random.uniform(ks[5], (d_model,), jnp.float32, -s, s),
    }


def prepare_params(params, num_heads):
    """One-time weight rearrangement so the kernels never slice/transpose activations:
       * KV weight columns become [all K heads (head-major) | all V heads],
       * the 1/sqrt(head_dim) attention scale is folded into the Q projection."""
    D = params["w_q"].shape[0]
    hd = D // num_heads
    scale = 1.0 / math.sqrt(hd)

    w_kv = params["w_kv"].reshape(D, num_heads, 2 * hd)
    b_kv = params["b_kv"].reshape(num_heads, 2 * hd)
    w_k = w_kv[:, :, :hd].reshape(D, D)
    w_v = w_kv[:, :, hd:].reshape(D, D)
    b_k = b_kv[:, :hd].reshape(D)
    b_v = b_kv[:, hd:].reshape(D)

    return {
        "w_q": params["w_q"] * scale,
        "b_q": params["b_q"] * scale,
        "w_kv": jnp.concatenate([w_k, w_v], axis=1),   # (D, 2D)
        "b_kv": jnp.concatenate([b_k, b_v], axis=0),   # (2D,)
        "w_out": params["w_out"],
        "b_out": params["b_out"],
    }


def make_valid_masks(src_seq, tgt_seq, src_pad_token=0, tgt_pad_token=0):
    """Separable validity vectors (the PyTorch cross_mask is exactly their outer AND)."""
    return ((src_seq != src_pad_token).astype(jnp.int32),
            (tgt_seq != tgt_pad_token).astype(jnp.int32))


def make_cross_mask(src_seq, tgt_seq, src_pad_token=0, tgt_pad_token=0):
    """Faithful port of cross_mask(): bool (B, 1, T, S) — used by the reference only."""
    src_valid = src_seq != src_pad_token
    tgt_valid = tgt_seq != tgt_pad_token
    mask = src_valid[:, None, :] & tgt_valid[:, :, None]
    return mask[:, None, :, :]


# ---------------------------------------------------------------------------
# Module forward
# ---------------------------------------------------------------------------

def multi_head_cross_attention(prep_params, x, y, num_heads,
                               src_valid=None, tgt_valid=None,
                               compute_dtype=jnp.bfloat16):
    """x: (B, S, D) memory, y: (B, T, D) queries -> (B, T, D).

    compute_dtype defaults to bf16 (bf16 MXU operands, f32 accumulation).  Pass
    float32 explicitly for a full-f32 validation path."""
    B, T, D = y.shape
    S = x.shape[1]
    out_dtype = y.dtype
    cd = jnp.dtype(compute_dtype or out_dtype)

    gen = _chip_generation()
    tm_t, tn_t, tk_t = _linear_tile_targets(gen)
    tq_t, tkv_t = _attn_tile_targets(gen)
    use_bf16_exp = (cd == jnp.dtype(jnp.bfloat16)) and (gen is None or gen >= 6)
    exp_dtype = jnp.bfloat16 if use_bf16_exp else jnp.float32

    if src_valid is None:
        src_valid = jnp.ones((B, S), jnp.int32)
    if tgt_valid is None:
        tgt_valid = jnp.ones((B, T), jnp.int32)

    w_q = prep_params["w_q"].astype(cd)
    w_kv = prep_params["w_kv"].astype(cd)
    w_out = prep_params["w_out"].astype(cd)

    q = pallas_linear(y.astype(cd).reshape(B * T, D), w_q, prep_params["b_q"],
                      out_dtype=cd, tm_target=tm_t, tn_target=tn_t,
                      tk_target=tk_t).reshape(B, T, D)
    kv = pallas_linear(x.astype(cd).reshape(B * S, D), w_kv, prep_params["b_kv"],
                       out_dtype=cd, tm_target=tm_t, tn_target=tn_t,
                       tk_target=tk_t).reshape(B, S, 2 * D)

    vals = pallas_flash_cross_attention(
        q, kv, tgt_valid, src_valid, num_heads,
        exp_dtype=exp_dtype, tq_target=tq_t, tkv_target=tkv_t,
        split_query_tiles=(gen == 7))

    out = pallas_linear(vals.reshape(B * T, D), w_out, prep_params["b_out"],
                        out_dtype=out_dtype, tm_target=tm_t, tn_target=tn_t,
                        tk_target=tk_t)
    return out.reshape(B, T, D)


# ---------------------------------------------------------------------------
# Pure-JAX reference (faithful port of the PyTorch module) for validation
# ---------------------------------------------------------------------------

def reference_forward(params, x, y, num_heads, cross_mask_=None):
    B, T, D = y.shape
    S = x.shape[1]
    hd = D // num_heads
    kv = x @ params["w_kv"] + params["b_kv"]
    q = y @ params["w_q"] + params["b_q"]
    kv = kv.reshape(B, S, num_heads, 2 * hd).transpose(0, 2, 1, 3)
    q = q.reshape(B, T, num_heads, hd).transpose(0, 2, 1, 3)
    k, v = kv[..., :hd], kv[..., hd:]
    scores = jnp.einsum("bhtd,bhsd->bhts", q, k) / math.sqrt(hd)
    if cross_mask_ is not None:
        scores = jnp.where(cross_mask_, scores, -jnp.inf)
    scores = jnp.clip(scores, -1.0e9, 1.0e9)
    attn = jax.nn.softmax(scores, axis=-1)
    vals = jnp.einsum("bhts,bhsd->bhtd", attn, v)
    vals = vals.transpose(0, 2, 1, 3).reshape(B, T, D)
    return vals @ params["w_out"] + params["b_out"]


# ---------------------------------------------------------------------------

if __name__ == "__main__":
    B, S, T = 2, 16, 8
    d_model, num_heads = 32, 4

    key = jax.random.PRNGKey(0)
    k_par, k_x, k_y, k_src, k_tgt = jax.random.split(key, 5)

    params = init_params(k_par, d_model)
    prep = prepare_params(params, num_heads)

    x = jax.random.normal(k_x, (B, S, d_model), jnp.float32)
    y = jax.random.normal(k_y, (B, T, d_model), jnp.float32)

    # Synthetic token ids with a few pads (0) to exercise the cross mask.
    src_seq = jax.random.randint(k_src, (B, S), 0, 5)
    tgt_seq = jax.random.randint(k_tgt, (B, T), 0, 5)
    src_seq = src_seq.at[:, 0].set(1)   # at least one valid src token per batch
    tgt_seq = tgt_seq.at[:, 0].set(1)

    src_valid, tgt_valid = make_valid_masks(src_seq, tgt_seq)
    cmask = make_cross_mask(src_seq, tgt_seq)   # reference only

    ref = reference_forward(params, x, y, num_heads, cmask)
    ref_nm = reference_forward(params, x, y, num_heads, None)

    # f32 validation path, masked.
    out_f32 = jax.block_until_ready(
        multi_head_cross_attention(prep, x, y, num_heads, src_valid, tgt_valid,
                                   compute_dtype=jnp.float32))
    np.testing.assert_allclose(np.asarray(out_f32), np.asarray(ref),
                               rtol=2e-2, atol=2e-2)

    # f32 validation path, mask=None.
    out_nm = jax.block_until_ready(
        multi_head_cross_attention(prep, x, y, num_heads, None, None,
                                   compute_dtype=jnp.float32))
    np.testing.assert_allclose(np.asarray(out_nm), np.asarray(ref_nm),
                               rtol=2e-2, atol=2e-2)

    # Default bf16 MXU path (f32 accumulation), looser tolerance.
    out_bf = jax.block_until_ready(
        multi_head_cross_attention(prep, x, y, num_heads, src_valid, tgt_valid))
    np.testing.assert_allclose(np.asarray(out_bf.astype(jnp.float32)),
                               np.asarray(ref), rtol=1e-1, atol=1e-1)

    print("KERNEL_OK")
</pallas_src>

<mosaic_0001>
module attributes {stable_mosaic.version = 11 : i64} {
  func.func @_linear_kernel(%arg0: i32, %arg1: i32, %arg2: i32, %arg3: memref<16x32xf32, #tpu.memory_space<vmem>>, %arg4: memref<32x32xf32, #tpu.memory_space<vmem>>, %arg5: memref<1x32xf32, #tpu.memory_space<vmem>>, %arg6: memref<16x32xf32, #tpu.memory_space<vmem>>, %arg7: memref<16x32xf32, #tpu.memory_space<vmem>>) attributes {dimension_semantics = [#tpu.dimension_semantics<parallel>, #tpu.dimension_semantics<parallel>, #tpu.dimension_semantics<arbitrary>], iteration_bounds = array<i64: 1, 1, 1>, scalar_prefetch = 0 : i64, scratch_operands = 1 : i64, tpu.core_type = #tpu.core_type<tc>, window_params = [{transform_indices = @transform_0, window_bounds = array<i64: 16, 32>}, {transform_indices = @transform_1, window_bounds = array<i64: 32, 32>}, {transform_indices = @transform_2, window_bounds = array<i64: 1, 32>}, {transform_indices = @transform_3, window_bounds = array<i64: 16, 32>}]} {
    %c0_i32 = arith.constant 0 : i32
    %0 = arith.cmpi eq, %arg2, %c0_i32 : i32
    %1 = arith.extui %0 : i1 to i32
    %c0_i32_0 = arith.constant 0 : i32
    %2 = arith.cmpi ne, %1, %c0_i32_0 : i32
    scf.if %2 {
      %cst_10 = arith.constant 0.000000e+00 : f32
      %12 = vector.broadcast %cst_10 : f32 to vector<16x32xf32>
      %c0_11 = arith.constant 0 : index
      %c0_12 = arith.constant 0 : index
      %13 = vector.load %arg7[%c0_11, %c0_12] : memref<16x32xf32, #tpu.memory_space<vmem>>, vector<16x32xf32>
      tpu.vector_store %arg7[%c0_11, %c0_12], %12 {strides = array<i32>} : memref<16x32xf32, #tpu.memory_space<vmem>>, vector<16x32xf32>,
    } else {
    }
    %c0 = arith.constant 0 : index
    %c0_1 = arith.constant 0 : index
    %3 = vector.load %arg7[%c0, %c0_1] : memref<16x32xf32, #tpu.memory_space<vmem>>, vector<16x32xf32>
    %c0_2 = arith.constant 0 : index
    %c0_3 = arith.constant 0 : index
    %4 = vector.load %arg3[%c0_2, %c0_3] : memref<16x32xf32, #tpu.memory_space<vmem>>, vector<16x32xf32>
    %c0_4 = arith.constant 0 : index
    %c0_5 = arith.constant 0 : index
    %5 = vector.load %arg4[%c0_4, %c0_5] : memref<32x32xf32, #tpu.memory_space<vmem>>, vector<32x32xf32>
    %cst = arith.constant dense<0.000000e+00> : vector<16x32xf32>
    %6 = tpu.matmul %4, %5, %cst {dimension_numbers = #tpu.dot_dimension_numbers<[1], [0], [0], [1], [0, 0, 1, 1], [], []>} : vector<16x32xf32>, vector<32x32xf32>, vector<16x32xf32> -> vector<16x32xf32>
    %7 = arith.addf %3, %6 : vector<16x32xf32>
    %c0_6 = arith.constant 0 : index
    %c0_7 = arith.constant 0 : index
    %8 = vector.load %arg7[%c0_6, %c0_7] : memref<16x32xf32, #tpu.memory_space<vmem>>, vector<16x32xf32>
    tpu.vector_store %arg7[%c0_6, %c0_7], %7 {strides = array<i32>} : memref<16x32xf32, #tpu.memory_space<vmem>>, vector<16x32xf32>,
    %c0_i32_8 = arith.constant 0 : i32
    %9 = arith.cmpi eq, %arg2, %c0_i32_8 : i32
    %10 = arith.extui %9 : i1 to i32
    %c0_i32_9 = arith.constant 0 : i32
    %11 = arith.cmpi ne, %10, %c0_i32_9 : i32
    scf.if %11 {
      %c0_10 = arith.constant 0 : index
      %c0_11 = arith.constant 0 : index
      %12 = vector.load %arg7[%c0_10, %c0_11] : memref<16x32xf32, #tpu.memory_space<vmem>>, vector<16x32xf32>
      %c0_12 = arith.constant 0 : index
      %c0_13 = arith.constant 0 : index
      %13 = vector.load %arg5[%c0_12, %c0_13] : memref<1x32xf32, #tpu.memory_space<vmem>>, vector<1x32xf32>
      %14 = vector.broadcast %13 : vector<1x32xf32> to vector<16x32xf32>
      %15 = arith.addf %12, %14 : vector<16x32xf32>
      %c0_14 = arith.constant 0 : index
      %c0_15 = arith.constant 0 : index
      %16 = vector.load %arg6[%c0_14, %c0_15] : memref<16x32xf32, #tpu.memory_space<vmem>>, vector<16x32xf32>
      tpu.vector_store %arg6[%c0_14, %c0_15], %15 {strides = array<i32>} : memref<16x32xf32, #tpu.memory_space<vmem>>, vector<16x32xf32>,
    } else {
    }
    return
  }
  func.func @transform_0(%arg0: i32, %arg1: i32, %arg2: i32) -> (i32, i32) {
    %c0_i32 = arith.constant 0 : i32
    return %arg0, %arg2 : i32, i32
  }
  func.func @transform_1(%arg0: i32, %arg1: i32, %arg2: i32) -> (i32, i32) {
    %c0_i32 = arith.constant 0 : i32
    return %arg2, %arg1 : i32, i32
  }
  func.func @transform_2(%arg0: i32, %arg1: i32, %arg2: i32) -> (i32, i32) {
    %c0_i32 = arith.constant 0 : i32
    %c0_i32_0 = arith.constant 0 : i32
    return %c0_i32, %arg1 : i32, i32
  }
  func.func @transform_3(%arg0: i32, %arg1: i32, %arg2: i32) -> (i32, i32) {
    %c0_i32 = arith.constant 0 : i32
    return %arg0, %arg1 : i32, i32
  }
}

</mosaic_0001>

<bundles_post_ra>
// kernel: tpu_custom_call.1
= control target key start
LH: loop header
LB: loop body
LE: loop exit
PB: predicated region body
PF: predicated region fallthrough
CT: control target
= control target key end

     0   :  { %8 = vsyncpa [#allocation4], 0  ;;  %s366_s0 = inlined_call_operand.hbm [shape: f32[16,32], index: 0, kind: input, shape index: {}]   ;;  %s367_s1 = inlined_call_operand.hbm [shape: f32[32,32], index: 1, kind: input, shape index: {}]   ;;  %s368_s2 = inlined_call_operand.vmem [shape: f32[1,32], index: 2, kind: input, shape index: {}]   ;;  %s369_s3 = inlined_call_operand.hbm [shape: f32[16,32], index: 3, kind: output, shape index: {}]  }
   0x1   :  { %9 = vsyncpa [#allocation7], 0 }
   0x2   :  { %10 = vsyncpa [#allocation5], 0  ;;  %s284_s12 = smov [#allocation3]   ;;  %s212_s16 = scalar_lea.hbm %s366_s0, 256 }
   0x3   :  { %s16_s13 = sshll.u32 %s284_s12, 4  ;;  %p213_p0 = scmp.ne.s32.totalorder %s366_s0, %s212_s16  ;;  %s17_s13 = int_to_ptr.vmem [resolvable:$true] %s16_s13 }
   0x4   :  { %p216_p1 = scmp.lt.u32.totalorder %s212_s16, %s366_s0 }
   0x6   :  { %p218_p2 = pnand %p216_p1, %p213_p0 }
   0x8   :  { %221 = shalt.err (!%p218_p2)
}
   0x9   :  { %s222_s21 = scalar_lea.vmem %s17_s13, 256  ;;  %p227_p4 = scmp.lt.s32.totalorder %s17_s13, %s17_s13 }
   0xa   :  { %p223_p3 = scmp.ne.s32.totalorder %s17_s13, %s222_s21  ;;  %p228_p5 = scmp.lt.s32.totalorder %s222_s21, %s222_s21 }
   0xc   :  { %p229_p6 = por %p228_p5, %p227_p4 }
   0xe   :  { %p230_p7 = pnand %p229_p6, %p223_p3 }
  0x10   :  { %233 = shalt.err (!%p230_p7)
}
  0x11   :  { %s285_s22 = smov 128   ;;  %s286_s23 = smov 8  }
  0x12   :  { %22 = dma.hbm_to_vmem [thread:$0]  %s366_s0, 256, %s17_s13, [#allocation4], %s285_s22, %s285_s22, %s286_s23  }
  0x13   :  { %s287_s26 = smov [#allocation6]   ;;  %s234_s30 = scalar_lea.hbm %s367_s1, 512 }
  0x14   :  { %s28_s27 = sshll.u32 %s287_s26, 4  ;;  %p235_p8 = scmp.ne.s32.totalorder %s367_s1, %s234_s30  ;;  %s29_s27 = int_to_ptr.vmem [resolvable:$true] %s28_s27 }
  0x15   :  { %p238_p9 = scmp.lt.u32.totalorder %s234_s30, %s367_s1 }
  0x17   :  { %p240_p10 = pnand %p238_p9, %p235_p8 }
  0x19   :  { %243 = shalt.err (!%p240_p10)
}
  0x1a   :  { %s244_s8 = scalar_lea.vmem %s29_s27, 512  ;;  %p249_p12 = scmp.lt.s32.totalorder %s29_s27, %s29_s27 }
  0x1b   :  { %p245_p11 = scmp.ne.s32.totalorder %s29_s27, %s244_s8  ;;  %p250_p13 = scmp.lt.s32.totalorder %s244_s8, %s244_s8 }
  0x1d   :  { %p251_p0 = por %p250_p13, %p249_p12 }
  0x1f   :  { %p252_p1 = pnand %p251_p0, %p245_p11 }
  0x21   :  { %255 = shalt.err (!%p252_p1)
}
  0x22   :  { %34 = dma.hbm_to_vmem [thread:$0]  %s367_s1, 512, %s29_s27, [#allocation7], %s285_s22, %s285_s22, %s286_s23  }
  0x23   :  { %278 = dma.done.wait [#allocation4], 256  }
  0x24   :  { %279 = vsyncadd [#allocation4], 4294967040 }
  0x25   :  { %280 = dma.done.wait [#allocation7], 512  }
  0x26   :  { %281 = vsyncadd [#allocation7], 4294966784  ;;  %vm47_vm0 = vcmask 261120   ;;  %v288_v0 = vmov 0.0   ;;  %v54_v1 = vld [vmem:[#allocation6] sm:$0xff]  ;;  %v55_v2 = vld [vmem:[#allocation6 + $0x8] sm:$0xff] }
  0x27   :  { %49 = vst.msk [vmem:[#allocation2 + $0x8] sm:$0xff] %vm47_vm0, %v288_v0  ;;  %48 = vst.msk [vmem:[#allocation2] sm:$0xff] %vm47_vm0, %v288_v0  ;;  %v56_v3 = vld [vmem:[#allocation6 + $0x10] sm:$0xff]  ;;  %v198_v4 = vpack.c.bf16 %v55_v2, %v54_v1  ;;  %v57_v5 = vld [vmem:[#allocation6 + $0x18] sm:$0xff]  ;;  %s289_s11 = smov [#allocation8]  }
  0x28   :  { %v52_v6 = vld [vmem:[#allocation3] sm:$0xff]  ;;  %v202_v7 = vpack.c.bf16 %v57_v5, %v56_v3  ;;  %v53_v8 = vld [vmem:[#allocation3 + $0x8] sm:$0xff]  ;;  %v180_v15 = vld [vmem:[%s368_s2] ss:$0 sm:$0xff]  ;;  %s165_s12 = sshll.u32 %s289_s11, 4  ;;  %s166_s12 = int_to_ptr.vmem [resolvable:$true] %s165_s12 }
  0x29   :  { %195 = vmatprep.mubr.msk.f32.mxu0 %vm47_vm0, %v52_v6  ;;  %199 = vmatprep.subr.bf16.mxu0 %v198_v4  ;;  %s256_s13 = scalar_lea.vmem %s166_s12, 256  ;;  %p261_p3 = scmp.lt.s32.totalorder %s166_s12, %s166_s12 }
  0x2a   :  { %201 = vmatpush3.bf16.msra.mxu0 %v198_v4  ;;  %p257_p2 = scmp.ne.s32.totalorder %s166_s12, %s256_s13  ;;  %p262_p4 = scmp.lt.s32.totalorder %s256_s13, %s256_s13 }
  0x2b   :  { %203 = vmatprep.subr.bf16.mxu0 %v202_v7 }
  0x2c   :  { %p263_p5 = por %p262_p4, %p261_p3 }
  0x2e   :  { %205 = vmatpush3.bf16.msra.mxu0 %v202_v7  ;;  %v51_v9 = vld [vmem:[#allocation2 + $0x8] sm:$0xff]  ;;  %v50_v10 = vld [vmem:[#allocation2] sm:$0xff]  ;;  %p264_p6 = pnand %p263_p5, %p257_p2 }
  0x31   :  { %196 = vmatmul.mubr.msk.f32.vlgmr.msra.gmra.mrb[0].mxu0 %vm47_vm0, %v53_v8 }
 0x104   :  { %v197_v11 = vpop.f32.mrb[0].mxu0 }
 0x105   :  { %v141_v12 = vadd.f32 %v197_v11, %v51_v9  ;;  %v131_v13 = vpop.f32.mrb[1].mxu0 }
 0x106   :  { %v140_v14 = vadd.f32 %v131_v13, %v50_v10 }
 0x107   :  { %143 = vst.msk [vmem:[#allocation2 + $0x8] sm:$0xff] %vm47_vm0, %v141_v12 }
 0x108   :  { %142 = vst.msk [vmem:[#allocation2] sm:$0xff] %vm47_vm0, %v140_v14 }
 0x10e   :  { %v148_v16 = vld [vmem:[#allocation2 + $0x8] sm:$0xff] }
 0x10f   :  { %v147_v17 = vld [vmem:[#allocation2] sm:$0xff]  ;;  %v157_v18 = vadd.f32 %v180_v15, %v148_v16 }
 0x110   :  { %v156_v19 = vadd.f32 %v180_v15, %v147_v17 }
 0x111   :  { %159 = vst.msk [vmem:[#allocation8 + $0x8] sm:$0xff] %vm47_vm0, %v157_v18 }
 0x112   :  { %158 = vst.msk [vmem:[#allocation8] sm:$0xff] %vm47_vm0, %v156_v19 }
 0x113   :  { %267 = shalt.err (!%p264_p6)
}
 0x114   :  { %s268_s15 = scalar_lea.hbm %s369_s3, 256 }
 0x115   :  { %p269_p7 = scmp.ne.s32.totalorder %s369_s3, %s268_s15  ;;  %p272_p8 = scmp.lt.u32.totalorder %s268_s15, %s369_s3 }
 0x117   :  { %p274_p9 = pnand %p272_p8, %p269_p7 }
 0x119   :  { %277 = shalt.err (!%p274_p9)
}
 0x11a   :  { %171 = dma.vmem_to_hbm [thread:$0]  %s166_s12, 256, %s369_s3, [#allocation5], %s285_s22, %s285_s22, %s286_s23  }
 0x11b   :  { %282 = dma.done.wait [#allocation5], 256  }
 0x11c   :  { %283 = vsyncadd [#allocation5], 4294967040 }
 0x11d   :  { %175 = vsyncpa [#allocation4], 1 }
 0x11e   :  { %176 = vsyncpa [#allocation7], 1 }
 0x11f   :  { %177 = vsyncpa [#allocation5], 1 }

</bundles_post_ra>
